<compile_context>
chip_gen: v7x
topology: tpu7x:2x2x1
jax: 0.10.0
libtpu: 0.0.40
codegen_flags: <defaults>
</compile_context>

<pallas_src>
import functools
import math

import jax
import jax.numpy as jnp
from jax.experimental import pallas as pl
from jax.experimental.pallas import tpu as pltpu


def aals_kernel(logits_ref, targets_ref, ca_ref, out_ref, *, num_classes):
    logits = logits_ref[...].astype(jnp.float32)        # (TB, C)
    tgt = targets_ref[...]                               # (TB, 1) int32
    ca = ca_ref[...].astype(jnp.float32)                 # (TB, 1)

    tb, c = logits.shape

    # Numerically-stable log-softmax pieces (no divides, no full log_preds).
    g_max = jnp.max(logits, axis=1, keepdims=True)                     # (TB, 1)
    shifted = logits - g_max                                           # (TB, C)
    lse = jnp.log(jnp.sum(jnp.exp(shifted), axis=1, keepdims=True))    # (TB, 1)

    # Cross-entropy with one-hot targets:  -log_preds[b, t_b] = lse - shifted[b, t_b]
    class_ids = jax.lax.broadcasted_iota(jnp.int32, (tb, c), 1)
    onehot = (class_ids == tgt).astype(jnp.float32)                    # (TB, C)
    tgt_shift = jnp.sum(onehot * shifted, axis=1, keepdims=True)       # (TB, 1)
    loss_ce = lse - tgt_shift                                          # (TB, 1)

    # KL(uniform || preds) summed over classes:
    #   sum_c (1/C) * (log(1/C) - log_preds) = -log(C) - (1/C) * sum_c log_preds
    # with sum_c log_preds = sum_c shifted - C * lse.
    inv_c = 1.0 / float(num_classes)
    log_c = math.log(float(num_classes))
    sum_shift = jnp.sum(shifted, axis=1, keepdims=True)                # (TB, 1)
    loss_kld = (-log_c) - inv_c * sum_shift + lse                      # (TB, 1)

    out_ref[...] = ca * loss_ce + (1.0 - ca) * loss_kld


def _pick_batch_tile(batch, num_classes):
    """Largest batch tile whose double-buffered logits block fits comfortably
    in scoped VMEM on every generation (v7x: 64 MiB physical / 32 MiB scoped)."""
    budget_bytes = 8 * 1024 * 1024           # per logits pipeline buffer
    tb = budget_bytes // (max(num_classes, 1) * 4)
    tb = max(8, min(256, tb))
    tb = (tb // 8) * 8                        # sublane-aligned for partial grids
    if batch <= tb:
        return batch                          # single block: full-dim block is always legal
    return tb


def aals_forward(logits, targets, ca):
    """logits: (B, C) float; targets: (B,) int; ca: (B,) float. Returns scalar f32."""
    b, c = logits.shape
    tb = _pick_batch_tile(b, c)
    num_blocks = pl.cdiv(b, tb)

    tgt = targets.astype(jnp.int32).reshape(b, 1)
    ca2 = ca.astype(jnp.float32).reshape(b, 1)

    kernel = functools.partial(aals_kernel, num_classes=c)

    per_sample = pl.pallas_call(
        kernel,
        out_shape=jax.ShapeDtypeStruct((b, 1), jnp.float32),
        grid=(num_blocks,),
        in_specs=[
            pl.BlockSpec((tb, c), lambda i: (i, 0)),
            pl.BlockSpec((tb, 1), lambda i: (i, 0)),
            pl.BlockSpec((tb, 1), lambda i: (i, 0)),
        ],
        out_specs=pl.BlockSpec((tb, 1), lambda i: (i, 0)),
        compiler_params=pltpu.CompilerParams(
            dimension_semantics=("parallel",)),
    )(logits, tgt, ca2)

    # Final mean over the batch (tiny XLA reduce; keeps the grid 'parallel').
    return jnp.mean(per_sample)


def aals_reference(logits, targets, ca):
    """Pure-JAX reference mirroring the PyTorch AALS forward."""
    _, c = logits.shape
    log_preds = jax.nn.log_softmax(logits, axis=1)
    onehot = jax.nn.one_hot(targets, c, dtype=jnp.float32)
    uni = 1.0 / c
    loss_ce = jnp.sum(-onehot * log_preds, axis=1)
    loss_kld = jnp.sum(uni * (jnp.log(uni) - log_preds), axis=1)
    return jnp.mean(ca * loss_ce + (1.0 - ca) * loss_kld)


if __name__ == "__main__":
    B, C = 8, 32
    key = jax.random.PRNGKey(0)
    k1, k2, k3 = jax.random.split(key, 3)

    logits = jax.random.normal(k1, (B, C), dtype=jnp.float32)
    targets = jax.random.randint(k2, (B,), 0, C, dtype=jnp.int32)
    ca = jax.random.uniform(k3, (B,), dtype=jnp.float32)

    loss = aals_forward(logits, targets, ca)
    jax.block_until_ready(loss)

    ref = aals_reference(logits, targets, ca)
    assert jnp.allclose(loss, ref, rtol=1e-5, atol=1e-5), (loss, ref)

    print("KERNEL_OK")
</pallas_src>

<mosaic_0001>
module attributes {stable_mosaic.version = 11 : i64} {
  func.func @aals_kernel(%arg0: i32, %arg1: memref<8x32xf32, #tpu.memory_space<vmem>>, %arg2: memref<8x1xi32, #tpu.memory_space<vmem>>, %arg3: memref<8x1xf32, #tpu.memory_space<vmem>>, %arg4: memref<8x1xf32, #tpu.memory_space<vmem>>) attributes {dimension_semantics = [#tpu.dimension_semantics<parallel>], iteration_bounds = array<i64: 1>, scalar_prefetch = 0 : i64, scratch_operands = 0 : i64, tpu.core_type = #tpu.core_type<tc>, window_params = [{transform_indices = @transform_0, window_bounds = array<i64: 8, 32>}, {transform_indices = @transform_1, window_bounds = array<i64: 8, 1>}, {transform_indices = @transform_2, window_bounds = array<i64: 8, 1>}, {transform_indices = @transform_3, window_bounds = array<i64: 8, 1>}]} {
    %c0 = arith.constant 0 : index
    %c0_0 = arith.constant 0 : index
    %0 = vector.load %arg1[%c0, %c0_0] : memref<8x32xf32, #tpu.memory_space<vmem>>, vector<8x32xf32>
    %c0_1 = arith.constant 0 : index
    %c0_2 = arith.constant 0 : index
    %1 = vector.load %arg2[%c0_1, %c0_2] : memref<8x1xi32, #tpu.memory_space<vmem>>, vector<8x1xi32>
    %c0_3 = arith.constant 0 : index
    %c0_4 = arith.constant 0 : index
    %2 = vector.load %arg3[%c0_3, %c0_4] : memref<8x1xf32, #tpu.memory_space<vmem>>, vector<8x1xf32>
    %cst = arith.constant dense<0xFF800000> : vector<8xf32>
    %3 = vector.multi_reduction <maximumf>, %0, %cst [1] : vector<8x32xf32> to vector<8xf32>
    %4 = vector.shape_cast %3 : vector<8xf32> to vector<8x1xf32>
    %5 = vector.broadcast %4 : vector<8x1xf32> to vector<8x32xf32>
    %6 = arith.subf %0, %5 : vector<8x32xf32>
    %7 = math.exp %6 : vector<8x32xf32>
    %cst_5 = arith.constant dense<0.000000e+00> : vector<8xf32>
    %8 = vector.multi_reduction <add>, %7, %cst_5 [1] : vector<8x32xf32> to vector<8xf32>
    %9 = vector.shape_cast %8 : vector<8xf32> to vector<8x1xf32>
    %10 = math.log %9 : vector<8x1xf32>
    %11 = tpu.iota {dimensions = array<i32: 1>} : vector<8x32xi32>
    %12 = vector.broadcast %1 : vector<8x1xi32> to vector<8x32xi32>
    %13 = arith.cmpi eq, %11, %12 : vector<8x32xi32>
    %14 = arith.extui %13 : vector<8x32xi1> to vector<8x32xi32>
    %15 = arith.sitofp %14 : vector<8x32xi32> to vector<8x32xf32>
    %16 = arith.mulf %15, %6 : vector<8x32xf32>
    %cst_6 = arith.constant dense<0.000000e+00> : vector<8xf32>
    %17 = vector.multi_reduction <add>, %16, %cst_6 [1] : vector<8x32xf32> to vector<8xf32>
    %18 = vector.shape_cast %17 : vector<8xf32> to vector<8x1xf32>
    %19 = arith.subf %10, %18 : vector<8x1xf32>
    %cst_7 = arith.constant dense<0.000000e+00> : vector<8xf32>
    %20 = vector.multi_reduction <add>, %6, %cst_7 [1] : vector<8x32xf32> to vector<8xf32>
    %21 = vector.shape_cast %20 : vector<8xf32> to vector<8x1xf32>
    %cst_8 = arith.constant 3.125000e-02 : f32
    %22 = vector.broadcast %cst_8 : f32 to vector<8x1xf32>
    %23 = arith.mulf %22, %21 : vector<8x1xf32>
    %cst_9 = arith.constant -3.46573591 : f32
    %24 = vector.broadcast %cst_9 : f32 to vector<8x1xf32>
    %25 = arith.subf %24, %23 : vector<8x1xf32>
    %26 = arith.addf %25, %10 : vector<8x1xf32>
    %27 = arith.mulf %2, %19 : vector<8x1xf32>
    %cst_10 = arith.constant 1.000000e+00 : f32
    %28 = vector.broadcast %cst_10 : f32 to vector<8x1xf32>
    %29 = arith.subf %28, %2 : vector<8x1xf32>
    %30 = arith.mulf %29, %26 : vector<8x1xf32>
    %31 = arith.addf %27, %30 : vector<8x1xf32>
    %c0_11 = arith.constant 0 : index
    %c0_12 = arith.constant 0 : index
    %32 = vector.load %arg4[%c0_11, %c0_12] : memref<8x1xf32, #tpu.memory_space<vmem>>, vector<8x1xf32>
    tpu.vector_store %arg4[%c0_11, %c0_12], %31 {strides = array<i32>} : memref<8x1xf32, #tpu.memory_space<vmem>>, vector<8x1xf32>,
    return
  }
  func.func @transform_0(%arg0: i32) -> (i32, i32) {
    %c0_i32 = arith.constant 0 : i32
    %c0_i32_0 = arith.constant 0 : i32
    return %arg0, %c0_i32 : i32, i32
  }
  func.func @transform_1(%arg0: i32) -> (i32, i32) {
    %c0_i32 = arith.constant 0 : i32
    %c0_i32_0 = arith.constant 0 : i32
    return %arg0, %c0_i32 : i32, i32
  }
  func.func @transform_2(%arg0: i32) -> (i32, i32) {
    %c0_i32 = arith.constant 0 : i32
    %c0_i32_0 = arith.constant 0 : i32
    return %arg0, %c0_i32 : i32, i32
  }
  func.func @transform_3(%arg0: i32) -> (i32, i32) {
    %c0_i32 = arith.constant 0 : i32
    %c0_i32_0 = arith.constant 0 : i32
    return %arg0, %c0_i32 : i32, i32
  }
}

</mosaic_0001>

<bundles_post_ra>
// kernel: tpu_custom_call.1
= control target key start
LH: loop header
LB: loop body
LE: loop exit
PB: predicated region body
PF: predicated region fallthrough
CT: control target
= control target key end

     0   :  { %vm17_vm0 = vcmask 261120   ;;  %v66_v1 = vmov 0   ;;  %v29_v7 = vlaneseq  ;;  %v67_v12 = vmov 0.0   ;;  %s104_s0 = inlined_call_operand.vmem [shape: f32[8,32], index: 0, kind: input, shape index: {}]   ;;  %s105_s1 = inlined_call_operand.vmem [shape: s32[8,1], index: 1, kind: input, shape index: {}]   ;;  %s106_s2 = inlined_call_operand.vmem [shape: f32[8,1], index: 2, kind: input, shape index: {}]   ;;  %s107_s3 = inlined_call_operand.vmem [shape: f32[8,1], index: 3, kind: output, shape index: {}]  }
   0x1   :  { %v14_v0 = vld [vmem:[%s104_s0] sm:$0xff]  ;;  %61 = vset.pattern.permute.xlu0 %v66_v1  ;;  %vm52_vm2 = vcmask 7168  }
   0x2   :  { %v18_v2 = vsel %vm17_vm0, %v14_v0, -inf  ;;  %v15_v3 = vld [vmem:[%s105_s1] sm:$0xff]  ;;  %v30_v8 = vand.u32 127, %v29_v7 }
   0x3   :  { %19 = vmax.xlane.f32.xlu0 %v18_v2  ;;  %v16_v20 = vld [vmem:[%s106_s2] sm:$0xff] }
   0x4   :  { %v49_v24 = vsub.f32 1.0, %v16_v20 }
  0x19   :  { %32 = vperm.xlu0 %61, %v15_v3  }
  0x90   :  { %v20_v4 = vpop.xlane.xlu0 %19 }
  0x91   :  { %v21_v5 = vsub.f32 %v14_v0, %v20_v4 }
  0x93   :  { %v22_v6 = vmul.f32 1.442695, %v21_v5  ;;  %v42_v14 = vsel %vm17_vm0, %v21_v5, 0.0 }
  0x95   :  { %62 = vpow2.f32 %v22_v6 }
  0x98   :  { %v33_v9 = vpop.permute.xlu0 %32 }
  0x99   :  { %vm34_vm1 = vcmp.eq.s32.totalorder %v30_v8, %v33_v9 }
  0x9a   :  { %v58_v13 = vsel %vm34_vm1, 1.0, %v67_v12 }
  0x9b   :  { %v37_v15 = vmul.f32 %v58_v13, %v21_v5 }
  0x9d   :  { %v38_v16 = vsel %vm17_vm0, %v37_v15, 0.0 }
  0x9f   :  { %v63_v10 = vpop.eup %62 }
  0xa0   :  { %v24_v11 = vsel %vm17_vm0, %v63_v10, 0.0 }
  0xa1   :  { %25 = vadd.xlane.f32.xlu1 %v24_v11 }
  0xa5   :  { %43 = vadd.xlane.f32.xlu1 %v42_v14 }
  0xa9   :  { %39 = vadd.xlane.f32.xlu1 %v38_v16 }
 0x12e   :  { %v26_v17 = vpop.xlane.xlu1 %25 }
 0x12f   :  { %64 = vlog2.f32 %v26_v17 }
 0x132   :  { %v44_v18 = vpop.xlane.xlu1 %43 }
 0x133   :  { %v45_v19 = vmul.f32 0.03125, %v44_v18 }
 0x135   :  { %v46_v22 = vsub.f32 -3.465736, %v45_v19 }
 0x136   :  { %v40_v25 = vpop.xlane.xlu1 %39 }
 0x139   :  { %v65_v21 = vpop.eup %64 }
 0x13a   :  { %v28_v23 = vmul.f32 0.6931472, %v65_v21 }
 0x13c   :  { %v47_v26 = vadd.f32 %v46_v22, %v28_v23  ;;  %v41_v27 = vsub.f32 %v28_v23, %v40_v25 }
 0x13e   :  { %v50_v28 = vmul.f32 %v49_v24, %v47_v26  ;;  %v48_v29 = vmul.f32 %v41_v27, %v16_v20 }
 0x140   :  { %v51_v30 = vadd.f32 %v50_v28, %v48_v29 }
 0x142   :  { %53 = vst.msk [vmem:[%s107_s3] sm:$0xff] %vm52_vm2, %v51_v30 }

</bundles_post_ra>
